<compile_context>
chip_gen: v5e
topology: v5e:2x2
jax: 0.10.0
libtpu: 0.0.40
codegen_flags: <defaults>
</compile_context>

<pallas_src>
import math

import jax
import jax.numpy as jnp
from jax.experimental import pallas as pl
from jax.experimental.pallas import tpu as pltpu


def _round_up(n, m):
    return ((n + m - 1) // m) * m


def vae_kernel(x_ref, eps_ref, wenc_ref, benc_ref, wdec_ref, bdec_ref, out_ref):
    # Fused encoder: one MXU matmul produces [mu | logvar] side by side.
    x = x_ref[...]  # bf16 (TILE_B, Dp)
    h = jnp.dot(x, wenc_ref[...], preferred_element_type=jnp.float32) + benc_ref[...]

    lp = h.shape[1] // 2
    mu = h[:, :lp]
    logvar = h[:, lp:]

    # reparametrize: z = eps * exp(0.5 * logvar) + mu   (eps ~ N(0,1), from wrapper)
    std = jnp.exp(0.5 * logvar)
    z = eps_ref[...] * std + mu

    # decoder + sigmoid
    logits = (jnp.dot(z.astype(wdec_ref.dtype), wdec_ref[...],
                      preferred_element_type=jnp.float32) + bdec_ref[...])
    out_ref[...] = jax.nn.sigmoid(logits).astype(out_ref.dtype)


def vae_forward(x, params, key, *, tile_b=512):
    """x: (B, dim_data) float32.  params: dict of torch-equivalent weights.
    key: jax PRNG key for the reparametrization noise."""
    B, D = x.shape
    L = params["w_mu"].shape[1]

    # Lane-aligned (128-multiple) padded dims.
    Dp = _round_up(D, 128)
    Lp = _round_up(L, 128)

    # Batch tiling (sublane-aligned).
    tile_b = min(tile_b, _round_up(B, 8))
    Bp = _round_up(B, tile_b)
    grid = (Bp // tile_b,)

    f32 = jnp.float32
    bf16 = jnp.bfloat16

    # Fused + padded encoder weights: mu cols [0:Lp), logvar cols [Lp:2Lp).
    w_enc = jnp.zeros((Dp, 2 * Lp), f32)
    w_enc = w_enc.at[:D, :L].set(params["w_mu"])
    w_enc = w_enc.at[:D, Lp:Lp + L].set(params["w_logvar"])
    b_enc = jnp.zeros((1, 2 * Lp), f32)
    b_enc = b_enc.at[0, :L].set(params["b_mu"])
    b_enc = b_enc.at[0, Lp:Lp + L].set(params["b_logvar"])

    # Padded decoder weights (padded latent rows are zero -> padded eps lanes
    # contribute nothing to the real output columns).
    w_dec = jnp.zeros((Lp, Dp), f32)
    w_dec = w_dec.at[:L, :D].set(params["w_dec"])
    b_dec = jnp.zeros((1, Dp), f32)
    b_dec = b_dec.at[0, :D].set(params["b_dec"])

    # Padded input and reparametrization noise.
    x_pad = jnp.zeros((Bp, Dp), f32).at[:B, :D].set(x)
    eps = jax.random.normal(key, (Bp, Lp), f32)

    x_bf = x_pad.astype(bf16)
    w_enc_bf = w_enc.astype(bf16)
    w_dec_bf = w_dec.astype(bf16)

    out = pl.pallas_call(
        vae_kernel,
        out_shape=jax.ShapeDtypeStruct((Bp, Dp), f32),
        grid=grid,
        in_specs=[
            pl.BlockSpec((tile_b, Dp), lambda i: (i, 0)),     # x tile
            pl.BlockSpec((tile_b, Lp), lambda i: (i, 0)),     # eps tile
            pl.BlockSpec((Dp, 2 * Lp), lambda i: (0, 0)),     # fused encoder W (resident)
            pl.BlockSpec((1, 2 * Lp), lambda i: (0, 0)),      # fused encoder b (resident)
            pl.BlockSpec((Lp, Dp), lambda i: (0, 0)),         # decoder W (resident)
            pl.BlockSpec((1, Dp), lambda i: (0, 0)),          # decoder b (resident)
        ],
        out_specs=pl.BlockSpec((tile_b, Dp), lambda i: (i, 0)),
        compiler_params=pltpu.CompilerParams(
            dimension_semantics=("parallel",),
            vmem_limit_bytes=32 * 1024 * 1024,
        ),
    )(x_bf, eps, w_enc_bf, b_enc, w_dec_bf, b_dec)

    # Strip batch / feature padding.
    return out[:B, :D]


def xavier_uniform(key, fan_in, fan_out):
    # Matches torch.nn.init.xavier_uniform_ on a (out, in) weight; returned
    # transposed as (in, out) so the kernel computes x @ W.
    bound = math.sqrt(6.0 / (fan_in + fan_out))
    w = jax.random.uniform(key, (fan_out, fan_in), jnp.float32, -bound, bound)
    return w.T


def init_params(key, dim_data, dim_latents):
    k1, k2, k3 = jax.random.split(key, 3)
    return {
        "w_mu": xavier_uniform(k1, dim_data, dim_latents),      # (dim_data, dim_latents)
        "b_mu": jnp.zeros((dim_latents,), jnp.float32),
        "w_logvar": xavier_uniform(k2, dim_data, dim_latents),  # (dim_data, dim_latents)
        "b_logvar": jnp.zeros((dim_latents,), jnp.float32),
        "w_dec": xavier_uniform(k3, dim_latents, dim_data),     # (dim_latents, dim_data)
        "b_dec": jnp.zeros((dim_data,), jnp.float32),
    }


if __name__ == "__main__":
    key = jax.random.PRNGKey(0)
    k_x, k_p, k_eps = jax.random.split(key, 3)

    batch, dim_data, dim_latents = 8, 64, 32
    x = jax.random.uniform(k_x, (batch, dim_data), jnp.float32)  # "data" in [0, 1)
    params = init_params(k_p, dim_data, dim_latents)

    x_recon = vae_forward(x, params, k_eps)
    x_recon = jax.block_until_ready(x_recon)

    assert x_recon.shape == (batch, dim_data)
    assert bool(jnp.all(jnp.isfinite(x_recon)))
    assert bool(jnp.all((x_recon >= 0.0) & (x_recon <= 1.0)))  # sigmoid output range
    print("KERNEL_OK")
</pallas_src>

<mosaic_0001>
module attributes {stable_mosaic.version = 11 : i64} {
  func.func @vae_kernel(%arg0: i32, %arg1: memref<8x128xbf16, #tpu.memory_space<vmem>>, %arg2: memref<8x128xf32, #tpu.memory_space<vmem>>, %arg3: memref<128x256xbf16, #tpu.memory_space<vmem>>, %arg4: memref<1x256xf32, #tpu.memory_space<vmem>>, %arg5: memref<128x128xbf16, #tpu.memory_space<vmem>>, %arg6: memref<1x128xf32, #tpu.memory_space<vmem>>, %arg7: memref<8x128xf32, #tpu.memory_space<vmem>>) attributes {dimension_semantics = [#tpu.dimension_semantics<parallel>], iteration_bounds = array<i64: 1>, scalar_prefetch = 0 : i64, scratch_operands = 0 : i64, tpu.core_type = #tpu.core_type<tc>, window_params = [{transform_indices = @transform_0, window_bounds = array<i64: 8, 128>}, {transform_indices = @transform_1, window_bounds = array<i64: 8, 128>}, {pipeline_mode = #tpu.pipeline_mode<synchronous>, transform_indices = @transform_2, window_bounds = array<i64: 128, 256>}, {pipeline_mode = #tpu.pipeline_mode<synchronous>, transform_indices = @transform_3, window_bounds = array<i64: 1, 256>}, {pipeline_mode = #tpu.pipeline_mode<synchronous>, transform_indices = @transform_4, window_bounds = array<i64: 128, 128>}, {pipeline_mode = #tpu.pipeline_mode<synchronous>, transform_indices = @transform_5, window_bounds = array<i64: 1, 128>}, {transform_indices = @transform_6, window_bounds = array<i64: 8, 128>}]} {
    %c0 = arith.constant 0 : index
    %c0_0 = arith.constant 0 : index
    %0 = vector.load %arg1[%c0, %c0_0] : memref<8x128xbf16, #tpu.memory_space<vmem>>, vector<8x128xbf16>
    %c0_1 = arith.constant 0 : index
    %c0_2 = arith.constant 0 : index
    %1 = vector.load %arg3[%c0_1, %c0_2] : memref<128x256xbf16, #tpu.memory_space<vmem>>, vector<128x256xbf16>
    %cst = arith.constant dense<0.000000e+00> : vector<8x256xf32>
    %2 = tpu.matmul %0, %1, %cst {dimension_numbers = #tpu.dot_dimension_numbers<[1], [0], [0], [1], [0, 0, 1, 1], [], []>} : vector<8x128xbf16>, vector<128x256xbf16>, vector<8x256xf32> -> vector<8x256xf32>
    %c0_3 = arith.constant 0 : index
    %c0_4 = arith.constant 0 : index
    %3 = vector.load %arg4[%c0_3, %c0_4] : memref<1x256xf32, #tpu.memory_space<vmem>>, vector<1x256xf32>
    %4 = vector.broadcast %3 : vector<1x256xf32> to vector<8x256xf32>
    %5 = arith.addf %2, %4 : vector<8x256xf32>
    %6 = vector.extract_strided_slice %5 {offsets = [0, 0], sizes = [8, 128], strides = [1, 1]} : vector<8x256xf32> to vector<8x128xf32>
    %7 = vector.extract_strided_slice %5 {offsets = [0, 128], sizes = [8, 128], strides = [1, 1]} : vector<8x256xf32> to vector<8x128xf32>
    %cst_5 = arith.constant 5.000000e-01 : f32
    %8 = vector.broadcast %cst_5 : f32 to vector<8x128xf32>
    %9 = arith.mulf %8, %7 : vector<8x128xf32>
    %10 = math.exp %9 : vector<8x128xf32>
    %c0_6 = arith.constant 0 : index
    %c0_7 = arith.constant 0 : index
    %11 = vector.load %arg2[%c0_6, %c0_7] : memref<8x128xf32, #tpu.memory_space<vmem>>, vector<8x128xf32>
    %12 = arith.mulf %11, %10 : vector<8x128xf32>
    %13 = arith.addf %12, %6 : vector<8x128xf32>
    %14 = arith.truncf %13 : vector<8x128xf32> to vector<8x128xbf16>
    %c0_8 = arith.constant 0 : index
    %c0_9 = arith.constant 0 : index
    %15 = vector.load %arg5[%c0_8, %c0_9] : memref<128x128xbf16, #tpu.memory_space<vmem>>, vector<128x128xbf16>
    %cst_10 = arith.constant dense<0.000000e+00> : vector<8x128xf32>
    %16 = tpu.matmul %14, %15, %cst_10 {dimension_numbers = #tpu.dot_dimension_numbers<[1], [0], [0], [1], [0, 0, 1, 1], [], []>} : vector<8x128xbf16>, vector<128x128xbf16>, vector<8x128xf32> -> vector<8x128xf32>
    %c0_11 = arith.constant 0 : index
    %c0_12 = arith.constant 0 : index
    %17 = vector.load %arg6[%c0_11, %c0_12] : memref<1x128xf32, #tpu.memory_space<vmem>>, vector<1x128xf32>
    %18 = vector.broadcast %17 : vector<1x128xf32> to vector<8x128xf32>
    %19 = arith.addf %16, %18 : vector<8x128xf32>
    %20 = arith.negf %19 : vector<8x128xf32>
    %21 = math.exp %20 : vector<8x128xf32>
    %cst_13 = arith.constant 1.000000e+00 : f32
    %22 = vector.broadcast %cst_13 : f32 to vector<8x128xf32>
    %23 = arith.addf %22, %21 : vector<8x128xf32>
    %24 = arith.divf %22, %23 : vector<8x128xf32>
    %c0_14 = arith.constant 0 : index
    %c0_15 = arith.constant 0 : index
    %25 = vector.load %arg7[%c0_14, %c0_15] : memref<8x128xf32, #tpu.memory_space<vmem>>, vector<8x128xf32>
    tpu.vector_store %arg7[%c0_14, %c0_15], %24 {strides = array<i32>} : memref<8x128xf32, #tpu.memory_space<vmem>>, vector<8x128xf32>,
    return
  }
  func.func @transform_0(%arg0: i32) -> (i32, i32) {
    %c0_i32 = arith.constant 0 : i32
    %c0_i32_0 = arith.constant 0 : i32
    return %arg0, %c0_i32 : i32, i32
  }
  func.func @transform_1(%arg0: i32) -> (i32, i32) {
    %c0_i32 = arith.constant 0 : i32
    %c0_i32_0 = arith.constant 0 : i32
    return %arg0, %c0_i32 : i32, i32
  }
  func.func @transform_2(%arg0: i32) -> (i32, i32) {
    %c0_i32 = arith.constant 0 : i32
    %c0_i32_0 = arith.constant 0 : i32
    %c0_i32_1 = arith.constant 0 : i32
    return %c0_i32, %c0_i32_0 : i32, i32
  }
  func.func @transform_3(%arg0: i32) -> (i32, i32) {
    %c0_i32 = arith.constant 0 : i32
    %c0_i32_0 = arith.constant 0 : i32
    %c0_i32_1 = arith.constant 0 : i32
    return %c0_i32, %c0_i32_0 : i32, i32
  }
  func.func @transform_4(%arg0: i32) -> (i32, i32) {
    %c0_i32 = arith.constant 0 : i32
    %c0_i32_0 = arith.constant 0 : i32
    %c0_i32_1 = arith.constant 0 : i32
    return %c0_i32, %c0_i32_0 : i32, i32
  }
  func.func @transform_5(%arg0: i32) -> (i32, i32) {
    %c0_i32 = arith.constant 0 : i32
    %c0_i32_0 = arith.constant 0 : i32
    %c0_i32_1 = arith.constant 0 : i32
    return %c0_i32, %c0_i32_0 : i32, i32
  }
  func.func @transform_6(%arg0: i32) -> (i32, i32) {
    %c0_i32 = arith.constant 0 : i32
    %c0_i32_0 = arith.constant 0 : i32
    return %arg0, %c0_i32 : i32, i32
  }
}

</mosaic_0001>

<bundles_post_ra>
// kernel: tpu_custom_call.1
= control target key start
LH: loop header
LB: loop body
LE: loop exit
PB: predicated region body
PF: predicated region fallthrough
CT: control target
= control target key end

     0   :  { %11 = vsyncpa [#allocation3], 0  ;;  %s669_s0 = inlined_call_operand.hbm [shape: bf16[8,128], index: 0, kind: input, shape index: {}]   ;;  %s670_s1 = inlined_call_operand.hbm [shape: f32[8,128], index: 1, kind: input, shape index: {}]   ;;  %s671_s2 = inlined_call_operand.hbm [shape: bf16[128,256], index: 2, kind: input, shape index: {}]   ;;  %s672_s3 = inlined_call_operand.vmem [shape: f32[1,256], index: 3, kind: input, shape index: {}]   ;;  %s673_s4 = inlined_call_operand.hbm [shape: bf16[128,128], index: 4, kind: input, shape index: {}]   ;;  %s674_s5 = inlined_call_operand.vmem [shape: f32[1,128], index: 5, kind: input, shape index: {}]   ;;  %s675_s6 = inlined_call_operand.hbm [shape: f32[8,128], index: 6, kind: output, shape index: {}]  }
   0x1   :  { %12 = vsyncpa [#allocation6], 0 }
   0x2   :  { %13 = vsyncpa [#allocation9], 0  ;;  %s31_s23 = sshll.u32 %s670_s1, 4  ;;  %s32_s23 = int_to_ptr.hbm [resolvable:$true] %s31_s23 }
   0x3   :  { %14 = vsyncpa [#allocation4], 0  ;;  %s604_s24 = smov [#allocation5]   ;;  %s20_s28 = sshll.u32 %s669_s0, 4  ;;  %s21_s28 = int_to_ptr.hbm [resolvable:$true] %s20_s28 }
   0x4   :  { %s33_s25 = sshll.u32 %s604_s24, 4  ;;  %s605_s29 = smov [#allocation2]   ;;  %s34_s25 = int_to_ptr.vmem [resolvable:$true] %s33_s25 }
   0x5   :  { %36 = dma.hbm_to_vmem [thread:$0]  %s32_s23, 128, %s34_s25, [#allocation6]  }
   0x6   :  { %s22_s30 = sshll.u32 %s605_s29, 4  ;;  %s41_s9 = sshll.u32 %s671_s2, 4  ;;  %s23_s30 = int_to_ptr.vmem [resolvable:$true] %s22_s30  ;;  %s42_s9 = int_to_ptr.hbm [resolvable:$true] %s41_s9 }
   0x7   :  { %25 = dma.hbm_to_vmem [thread:$0]  %s21_s28, 64, %s23_s30, [#allocation3]  }
   0x8   :  { %s606_s1 = smov [#allocation7]   ;;  %s56_s13 = sshll.u32 %s673_s4, 4  ;;  %s57_s13 = int_to_ptr.hbm [resolvable:$true] %s56_s13 }
   0x9   :  { %s43_s10 = sshll.u32 %s606_s1, 4  ;;  %s607_s14 = smov 128   ;;  %s44_s10 = int_to_ptr.vmem [resolvable:$true] %s43_s10 }
   0xa   :  { %s608_s0 = smov 8   ;;  %s609_s15 = smov [#allocation8]  }
   0xb   :  { %49 = dma.hbm_to_vmem [thread:$0]  %s42_s9, 2048, %s44_s10, [#allocation6], %s607_s14, %s607_s14, %s608_s0  }
   0xc   :  { %s58_s16 = sshll.u32 %s609_s15, 4  ;;  %s610_s17 = smov 64   ;;  %s59_s16 = int_to_ptr.vmem [resolvable:$true] %s58_s16 }
   0xd   :  { %s611_s18 = smov 4  }
   0xe   :  { %64 = dma.hbm_to_vmem [thread:$0]  %s57_s13, 1024, %s59_s16, [#allocation9], %s610_s17, %s610_s17, %s611_s18  }
   0xf   :  { %596 = dma.done.wait [#allocation3], 64  }
  0x10   :  { %597 = vsyncadd [#allocation3], 4294967232 }
  0x11   :  { %598 = dma.done.wait [#allocation6], 2176  }
  0x12   :  { %599 = vsyncadd [#allocation6], 4294965120 }
  0x13   :  { %600 = dma.done.wait [#allocation9], 1024  }
  0x14   :  { %601 = vsyncadd [#allocation9], 4294966272  ;;  %v450_v0 = vld [vmem:[#allocation7 + $0x74] sm:$0xf]  ;;  %v399_v1 = vld [vmem:[#allocation7 + $0x78] sm:$0xf0] }
  0x15   :  { %v448_v2 = vld [vmem:[#allocation7 + $0x64] sm:$0xf]  ;;  %v402_v3 = vor.u32 %v450_v0, %v399_v1  ;;  %v391_v4 = vld [vmem:[#allocation7 + $0x68] sm:$0xf0]  ;;  %v397_v5 = vld [vmem:[#allocation7 + $0x70] sm:$0xf] }
  0x16   :  { %v451_v6 = vld [vmem:[#allocation7 + $0x74] sm:$0xf0]  ;;  %v389_v8 = vld [vmem:[#allocation7 + $0x60] sm:$0xf]  ;;  %v394_v9 = vor.u32 %v448_v2, %v391_v4  ;;  %v449_v10 = vld [vmem:[#allocation7 + $0x64] sm:$0xf0] }
  0x17   :  { %v398_v7 = vor.u32 %v451_v6, %v397_v5  ;;  %199 = vmatpush.bf16.msra.mxu1 %v402_v3  ;;  %v446_v11 = vld [vmem:[#allocation7 + $0x54] sm:$0xf]  ;;  %v383_v12 = vld [vmem:[#allocation7 + $0x58] sm:$0xf0]  ;;  %v390_v13 = vor.u32 %v449_v10, %v389_v8  ;;  %v381_v14 = vld [vmem:[#allocation7 + $0x50] sm:$0xf] }
  0x18   :  { %v447_v15 = vld [vmem:[#allocation7 + $0x54] sm:$0xf0]  ;;  %v386_v16 = vor.u32 %v446_v11, %v383_v12  ;;  %v444_v17 = vld [vmem:[#allocation7 + $0x44] sm:$0xf]  ;;  %v375_v18 = vld [vmem:[#allocation7 + $0x48] sm:$0xf0] }
  0x19   :  { %186 = vmatpush.bf16.msra.mxu0 %v398_v7  ;;  %v382_v19 = vor.u32 %v447_v15, %v381_v14  ;;  %v373_v20 = vld [vmem:[#allocation7 + $0x40] sm:$0xf]  ;;  %v445_v21 = vld [vmem:[#allocation7 + $0x44] sm:$0xf0]  ;;  %v378_v22 = vor.u32 %v444_v17, %v375_v18  ;;  %v459_v23 = vld [vmem:[#allocation8 + $0x38] sm:$0xff] }
  0x1a   :  { %v442_v24 = vld [vmem:[#allocation7 + $0x34] sm:$0xf]  ;;  %v367_v25 = vld [vmem:[#allocation7 + $0x38] sm:$0xf0]  ;;  %v374_v26 = vor.u32 %v445_v21, %v373_v20  ;;  %v365_v27 = vld [vmem:[#allocation7 + $0x30] sm:$0xf]  ;;  %287 = vmatpush.bf16.msra.mxu2 %v459_v23 }
  0x1b   :  { %200 = vmatpush.bf16.msra.mxu1 %v394_v9  ;;  %v443_v28 = vld [vmem:[#allocation7 + $0x34] sm:$0xf0]  ;;  %v458_v29 = vld [vmem:[#allocation8 + $0x30] sm:$0xff]  ;;  %v370_v30 = vor.u32 %v442_v24, %v367_v25  ;;  %v440_v31 = vld [vmem:[#allocation7 + $0x24] sm:$0xf] }
  0x1c   :  { %v359_v32 = vld [vmem:[#allocation7 + $0x28] sm:$0xf0]  ;;  %v366_v33 = vor.u32 %v443_v28, %v365_v27  ;;  %v357_v34 = vld [vmem:[#allocation7 + $0x20] sm:$0xf]  ;;  %v441_v35 = vld [vmem:[#allocation7 + $0x24] sm:$0xf0] }
  0x1d   :  { %187 = vmatpush.bf16.msra.mxu0 %v390_v13  ;;  %v457_v36 = vld [vmem:[#allocation8 + $0x28] sm:$0xff]  ;;  %v362_v37 = vor.u32 %v440_v31, %v359_v32  ;;  %v438_v38 = vld [vmem:[#allocation7 + $0x14] sm:$0xf]  ;;  %v351_v39 = vld [vmem:[#allocation7 + $0x18] sm:$0xf0]  ;;  %v358_v40 = vor.u32 %v441_v35, %v357_v34 }
  0x1e   :  { %288 = vmatpush.bf16.msra.mxu2 %v458_v29  ;;  %v349_v41 = vld [vmem:[#allocation7 + $0x10] sm:$0xf]  ;;  %v439_v42 = vld [vmem:[#allocation7 + $0x14] sm:$0xf0]  ;;  %v354_v43 = vor.u32 %v438_v38, %v351_v39  ;;  %v436_v44 = vld [vmem:[#allocation7 + $0x4] sm:$0xf] }
  0x1f   :  { %201 = vmatpush.bf16.msra.mxu1 %v386_v16  ;;  %v343_v45 = vld [vmem:[#allocation7 + $0x8] sm:$0xf0]  ;;  %v350_v46 = vor.u32 %v439_v42, %v349_v41  ;;  %v341_v47 = vld [vmem:[#allocation7] sm:$0xf]  ;;  %v437_v48 = vld [vmem:[#allocation7 + $0x4] sm:$0xf0] }
  0x20   :  { %v346_v49 = vor.u32 %v436_v44, %v343_v45  ;;  %v342_v50 = vor.u32 %v437_v48, %v341_v47  ;;  %v83_v51 = vld [vmem:[#allocation2] sm:$0xf]  ;;  %v456_v52 = vld [vmem:[#allocation8 + $0x20] sm:$0xff]  ;;  %v455_v53 = vld [vmem:[#allocation8 + $0x18] sm:$0xff] }
  0x21   :  { %188 = vmatpush.bf16.msra.mxu0 %v382_v19  ;;  %v454_v54 = vld [vmem:[#allocation8 + $0x10] sm:$0xff]  ;;  %v453_v55 = vld [vmem:[#allocation8 + $0x8] sm:$0xff]  ;;  %v452_v56 = vld [vmem:[#allocation8] sm:$0xff] }
  0x22   :  { %289 = vmatpush.bf16.msra.mxu2 %v457_v36  ;;  %v100_v57 = vld [vmem:[%s672_s3] sm:$0x3]  ;;  %v215_v3 = vld [vmem:[#allocation5] sm:$0xff]  ;;  %s612_s3 = smov [#allocation10]  }
  0x23   :  { %202 = vmatpush.bf16.msra.mxu1 %v378_v22  ;;  %v103_v58 = vperm.slane %v100_v57, 1  ;;  %v102_v0 = vperm.slane %v100_v57, 0  ;;  %v469_v9 = vld [vmem:[%s674_s5] ss:$0 sm:$0xff]  ;;  %s325_s21 = sshll.u32 %s612_s3, 4  ;;  %s327_s5 = sshll.u32 %s675_s6, 4  ;;  %s326_s21 = int_to_ptr.vmem [resolvable:$true] %s325_s21  ;;  %s328_s5 = int_to_ptr.hbm [resolvable:$true] %s327_s5 }
  0x25   :  { %189 = vmatpush.bf16.msra.mxu0 %v374_v26 }
  0x26   :  { %290 = vmatpush.bf16.msra.mxu2 %v456_v52 }
  0x27   :  { %203 = vmatpush.bf16.msra.mxu1 %v370_v30 }
  0x29   :  { %190 = vmatpush.bf16.msra.mxu0 %v366_v33 }
  0x2a   :  { %291 = vmatpush.bf16.msra.mxu2 %v455_v53 }
  0x2b   :  { %204 = vmatpush.bf16.msra.mxu1 %v362_v37 }
  0x2d   :  { %191 = vmatpush.bf16.msra.mxu0 %v358_v40 }
  0x2e   :  { %292 = vmatpush.bf16.msra.mxu2 %v454_v54 }
  0x2f   :  { %205 = vmatpush.bf16.msra.mxu1 %v354_v43 }
  0x31   :  { %192 = vmatpush.bf16.msra.mxu0 %v350_v46 }
  0x32   :  { %293 = vmatpush.bf16.msra.mxu2 %v453_v55 }
  0x33   :  { %206 = vmatpush.bf16.msra.mxu1 %v346_v49 }
  0x35   :  { %193 = vmatpush.bf16.msra.mxu0 %v342_v50 }
  0x36   :  { %207 = vmatmul.bf16.vlgmr.msra.gmra.mxu1 %v83_v51  ;;  %294 = vmatpush.bf16.msra.mxu2 %v452_v56 }
  0x38   :  { %194 = vmatmul.bf16.vlgmr.msra.gmra.mxu0 %v83_v51 }
  0xb3   :  { %v208_v59 = vpop.f32.mrf.mxu1 }
  0xb4   :  { %v209_v60 = vadd.f32 %v208_v59, %v103_v58 }
  0xb5   :  { %v195_v61 = vpop.f32.mrf.mxu0 }
  0xb6   :  { %v212_v62 = vmul.f32 0.5, %v209_v60  ;;  %v196_v4 = vadd.f32 %v195_v61, %v102_v0 }
  0xb8   :  { %v213_v63 = vmul.f32 1.442695, %v212_v62 }
  0xba   :  { %470 = vpow2.f32 %v213_v63 }
  0xbb   :  { %v210_v1 = vpop.f32.mrf.mxu1 }
  0xbd   :  { %v197_v2 = vpop.f32.mrf.mxu0 }
  0xc0   :  { %v471_v5 = vpop.eup %470 }
  0xc1   :  { %v216_v6 = vmul.f32 %v471_v5, %v215_v3 }
  0xc3   :  { %v217_v7 = vadd.f32 %v216_v6, %v196_v4 }
  0xc5   :  { %v218_v8 = vpack.c.bf16 %v217_v7, %v217_v7 }
  0xc7   :  { %295 = vmatmul.bf16.vlgmr.msra.gmra.mxu2 %v218_v8 }
 0x14a   :  { %v296_v10 = vpop.f32.mrf.mxu2 }
 0x14b   :  { %v297_v11 = vadd.f32 %v469_v9, %v296_v10 }
 0x14d   :  { %v435_v12 = vmul.f32 -1.442695, %v297_v11 }
 0x14f   :  { %472 = vpow2.f32 %v435_v12 }
 0x152   :  { %v298_v13 = vpop.f32.mrf.mxu2 }
 0x155   :  { %v473_v14 = vpop.eup %472 }
 0x156   :  { %v303_v15 = vadd.f32 1.0, %v473_v14 }
 0x158   :  { %474 = vrcp.f32 %v303_v15  ;;  %v315_v19 = vand.u32 2147483648, %v303_v15  ;;  %v313_v21 = vand.u32 2147483647, %v303_v15  ;;  %vm309_vm1 = vweird.f32 %v303_v15 }
 0x15a   :  { %v316_v23 = vor.u32 1.1754944e-38, %v315_v19  ;;  %vm314_vm3 = vcmp.eq.f32.partialorder %v313_v21, 8.507059e+37 }
 0x15e   :  { %v475_v16 = vpop.eup %474 }
 0x15f   :  { %v305_v17 = vmul.f32 %v475_v16, %v303_v15  ;;  %vm310_vm0 = vweird.f32 %v475_v16 }
 0x160   :  { %vm311_vm2 = vmor %vm309_vm1, %vm310_vm0 }
 0x161   :  { %v306_v18 = vsub.f32 1.0, %v305_v17 }
 0x163   :  { %v307_v20 = vmul.f32 %v475_v16, %v306_v18 }
 0x165   :  { %v308_v22 = vadd.f32 %v475_v16, %v307_v20 }
 0x167   :  { %v312_v24 = vsel %vm311_vm2, %v475_v16, %v308_v22 }
 0x168   :  { %v317_v25 = vsel %vm314_vm3, %v316_v23, %v312_v24 }
 0x169   :  { %319 = vst [vmem:[#allocation10] sm:$0xff] %v317_v25 }
 0x16a   :  { %330 = dma.vmem_to_hbm [thread:$0]  %s326_s21, 128, %s328_s5, [#allocation4]  }
 0x16b   :  { %602 = dma.done.wait [#allocation4], 128  }
 0x16c   :  { %603 = vsyncadd [#allocation4], 4294967168 }
 0x16d   :  { %335 = vsyncpa [#allocation3], 1 }
 0x16e   :  { %336 = vsyncpa [#allocation6], 1 }
 0x16f   :  { %337 = vsyncpa [#allocation9], 1 }
 0x170   :  { %338 = vsyncpa [#allocation4], 1 }

</bundles_post_ra>
